<compile_context>
chip_gen: v5e
topology: v5e:2x2
jax: 0.10.0
libtpu: 0.0.40
codegen_flags: <defaults>
</compile_context>

<pallas_src>
import jax
import jax.numpy as jnp
from jax import lax
from jax.experimental import pallas as pl
from jax.experimental.pallas import tpu as pltpu

EPS = 1e-5          # InstanceNorm2d default eps
NEG_SLOPE = 0.2     # LeakyReLU slope
KH = KW = 4
PAD = 1


def _vmem_capacity_bytes():
    try:
        return int(pltpu.get_tpu_info().vmem_capacity_bytes)
    except Exception:
        return 64 * 1024 * 1024  # v7x floor; v5e/v6e have 128 MiB


def _choose_p_tile(P, max_p_tile):
    """Lane tile for the spatial axis.  Prefer (a) the full axis, else (b) the
    largest multiple of 128 <= max_p_tile that divides P (no pad and no output
    slice copy), else (c) pad to a multiple of a 128-aligned tile."""
    if P <= max_p_tile:
        return P, 1, P
    t = max((max_p_tile // 128) * 128, 128)
    cand = t
    while cand >= 128:
        if P % cand == 0:
            return cand, P // cand, P
        cand -= 128
    n_pt = -(-P // t)
    return t, n_pt, n_pt * t


# --------------------------------------------------------------------------
# Fused kernel: conv (matmul) + InstanceNorm stats + normalize + LeakyReLU.
# Grid = (N, channel_blocks, n_pt); the P axis MUST stay innermost and
# "arbitrary": the stats accumulators and the output-resident block rely on
# sequential visits of p and on write-back-on-block-change semantics.
# --------------------------------------------------------------------------
def _make_fused_kernel(n_pt, p_tile, true_p):
    inv_p = 1.0 / float(true_p)

    def kernel(p_ref, w_ref, out_ref, acc_s, acc_q):
        # p_ref  : (1, K, p_tile)     bf16 im2col tile, P on the 128-lane axis
        # w_ref  : (c_blk, K)         bf16 weight rows for this channel block
        # out_ref: (1, c_blk, p_pad)  resident across the p axis (index const)
        # acc_s / acc_q: (c_blk, 1)   f32 per-channel sum / sum-of-squares
        p = pl.program_id(2)

        @pl.when(p == 0)
        def _init():
            acc_s[...] = jnp.zeros_like(acc_s)
            acc_q[...] = jnp.zeros_like(acc_q)

        # Conv as matmul on the MXU: bf16 inputs, f32 accumulation.
        y = jnp.dot(w_ref[...], p_ref[0],
                    preferred_element_type=jnp.float32)        # (c_blk, p_tile)
        acc_s[...] += jnp.sum(y, axis=1, keepdims=True)
        acc_q[...] += jnp.sum(y * y, axis=1, keepdims=True)

        if n_pt > 1:
            # Stash the raw conv tile in the resident output block.  n_pt is a
            # small static count, so static-offset stores are used (no dynamic
            # lane-offset store needed).
            if n_pt <= 32:
                for i in range(n_pt):
                    @pl.when(p == i)
                    def _store(i=i):
                        out_ref[0, :, i * p_tile:(i + 1) * p_tile] = (
                            y.astype(out_ref.dtype))
            else:
                start = pl.multiple_of(p * p_tile, p_tile)
                out_ref[0, :, pl.ds(start, p_tile)] = y.astype(out_ref.dtype)

        @pl.when(p == n_pt - 1)
        def _finalize():
            # E[x^2]-E[x]^2 in f32 (clamped): fine for GAN-scale activations.
            mean = acc_s[...] * inv_p
            var = jnp.maximum(acc_q[...] * inv_p - mean * mean, 0.0)
            scale = lax.rsqrt(var + EPS)
            shift = -mean * scale
            base = y if n_pt == 1 else out_ref[0].astype(jnp.float32)
            z = base * scale + shift
            out_ref[0] = jnp.maximum(z, NEG_SLOPE * z).astype(out_ref.dtype)

    return kernel


# --------------------------------------------------------------------------
# Fallback two-phase kernels (only used if the resident buffer would not fit
# the VMEM cap).  Intermediate is bf16 to halve its HBM traffic.
# --------------------------------------------------------------------------
def _make_conv_stats_kernel(n_pt):
    def kernel(p_ref, w_ref, y_ref, sum_ref, sq_ref, acc_s, acc_q):
        p = pl.program_id(2)

        @pl.when(p == 0)
        def _init():
            acc_s[...] = jnp.zeros_like(acc_s)
            acc_q[...] = jnp.zeros_like(acc_q)

        y = jnp.dot(w_ref[...], p_ref[0], preferred_element_type=jnp.float32)
        y_ref[0] = y.astype(y_ref.dtype)                     # bf16 intermediate
        acc_s[...] += jnp.sum(y, axis=1, keepdims=True)
        acc_q[...] += jnp.sum(y * y, axis=1, keepdims=True)

        @pl.when(p == n_pt - 1)
        def _fin():
            sum_ref[0] = acc_s[...]
            sq_ref[0] = acc_q[...]

    return kernel


def _norm_act_kernel(y_ref, scale_ref, shift_ref, out_ref):
    z = y_ref[0].astype(jnp.float32) * scale_ref[0] + shift_ref[0]
    out_ref[0] = jnp.maximum(z, NEG_SLOPE * z).astype(out_ref.dtype)


# --------------------------------------------------------------------------
# Wrapper
# --------------------------------------------------------------------------
def block_forward(x_nchw, weight, bias, stride, *, max_p_tile=1024,
                  channel_blocks=None, fused_cap_bytes=None):
    """Forward pass of `Block`.  x_nchw: (N, C_in, H, W), weight:
    (C_out, C_in, 4, 4), bias: (C_out,).  Returns (N, C_out, H_out, W_out).

    `bias` is accepted for API parity but unused: InstanceNorm(affine=False)
    subtracts the per-channel mean, which cancels a per-channel constant
    exactly (document this if the norm is ever changed)."""
    del bias  # mathematical no-op under InstanceNorm, see docstring

    N, C_in, H, W = x_nchw.shape
    C_out = weight.shape[0]
    H_out = (H + 2 * PAD - KH) // stride + 1
    W_out = (W + 2 * PAD - KW) // stride + 1
    P = H_out * W_out
    K = KH * KW * C_in
    out_dtype = x_nchw.dtype
    out_itemsize = jnp.dtype(out_dtype).itemsize
    max_p_tile = max(int(max_p_tile), 128)

    # Channel blocks: per-channel stats are independent, so splitting C_out is
    # a clean second "parallel" grid axis (keeps both v7x TensorCores busy at
    # N == 1 and shrinks the resident buffer).
    if channel_blocks is None:
        channel_blocks = 2 if (N == 1 and C_out % 16 == 0) else 1
    if channel_blocks < 1 or C_out % channel_blocks != 0 or \
            (channel_blocks > 1 and (C_out // channel_blocks) % 8 != 0):
        channel_blocks = 1
    c_blk = C_out // channel_blocks

    # ---- XLA glue: bf16 im2col in transposed (N, K, P) layout, P lane-dense.
    # TODO(synk): fold the 16 (kh,kw) taps into the kernel to avoid this.
    x = jnp.transpose(x_nchw, (0, 2, 3, 1)).astype(jnp.bfloat16)    # (N,H,W,Cin)
    x_pad = jnp.pad(x, ((0, 0), (PAD, PAD), (PAD, PAD), (0, 0)))
    taps = []
    for kh in range(KH):
        for kw in range(KW):
            taps.append(
                x_pad[:, kh:kh + stride * (H_out - 1) + 1:stride,
                         kw:kw + stride * (W_out - 1) + 1:stride, :])
    patches = jnp.stack(taps, axis=1)                       # (N,16,Ho,Wo,Cin)
    patches = jnp.transpose(patches, (0, 1, 4, 2, 3)).reshape(N, K, P)
    w_t = jnp.transpose(weight, (0, 2, 3, 1)).reshape(C_out, K).astype(jnp.bfloat16)

    vmem_cap = _vmem_capacity_bytes()
    if fused_cap_bytes is None:
        fused_cap_bytes = min(24 << 20, int(0.45 * vmem_cap))

    # ---- pick the spatial tile; shrink it before giving up on fusion --------
    fused = False
    cands = [max_p_tile] + [t for t in (512, 256) if t < max_p_tile]
    p_tile = n_pt = p_pad = est = None
    for mpt in cands:
        pt, npt, ppad = _choose_p_tile(P, mpt)
        e = (2 * K * pt * 2 + 2 * c_blk * K * 2
             + 2 * c_blk * ppad * out_itemsize + 4096)
        if e <= fused_cap_bytes:
            fused, p_tile, n_pt, p_pad, est = True, pt, npt, ppad, e
            break
    if not fused:
        p_tile, n_pt, p_pad = _choose_p_tile(P, max_p_tile)
        est = (2 * K * p_tile * 2 + 2 * c_blk * K * 2
               + 2 * c_blk * p_tile * 2 + 4096)

    if p_pad != P:
        # Zero columns give conv output 0 => contribute nothing to the sums;
        # the stats divide by the true P, so padding is exact.
        patches = jnp.pad(patches, ((0, 0), (0, 0), (0, p_pad - P)))

    vmem_limit = int(min(0.9 * vmem_cap, max(2 * est, 32 << 20)))
    grid = (N, channel_blocks, n_pt)
    cost = pl.CostEstimate(
        flops=2 * N * C_out * K * p_pad,
        transcendentals=N * C_out,
        bytes_accessed=int(patches.size * 2 * channel_blocks + w_t.size * 2 * N
                           + N * C_out * p_pad * out_itemsize))

    if fused:
        out = pl.pallas_call(
            _make_fused_kernel(n_pt, p_tile, P),
            out_shape=jax.ShapeDtypeStruct((N, C_out, p_pad), out_dtype),
            grid_spec=pltpu.PrefetchScalarGridSpec(
                num_scalar_prefetch=0,
                grid=grid,
                in_specs=[
                    pl.BlockSpec((1, K, p_tile), lambda n, c, p: (n, 0, p)),
                    pl.BlockSpec((c_blk, K), lambda n, c, p: (c, 0)),
                ],
                out_specs=pl.BlockSpec((1, c_blk, p_pad),
                                       lambda n, c, p: (n, c, 0)),
                scratch_shapes=[pltpu.VMEM((c_blk, 1), jnp.float32),
                                pltpu.VMEM((c_blk, 1), jnp.float32)],
            ),
            compiler_params=pltpu.CompilerParams(
                dimension_semantics=("parallel", "parallel", "arbitrary"),
                vmem_limit_bytes=vmem_limit),
            cost_estimate=cost,
        )(patches, w_t)
    else:
        # ---- fallback phase 1: conv tiles (bf16) + per-channel sums ----
        conv_y, s1, s2 = pl.pallas_call(
            _make_conv_stats_kernel(n_pt),
            out_shape=(
                jax.ShapeDtypeStruct((N, C_out, p_pad), jnp.bfloat16),
                jax.ShapeDtypeStruct((N, C_out, 1), jnp.float32),
                jax.ShapeDtypeStruct((N, C_out, 1), jnp.float32),
            ),
            grid_spec=pltpu.PrefetchScalarGridSpec(
                num_scalar_prefetch=0,
                grid=grid,
                in_specs=[
                    pl.BlockSpec((1, K, p_tile), lambda n, c, p: (n, 0, p)),
                    pl.BlockSpec((c_blk, K), lambda n, c, p: (c, 0)),
                ],
                out_specs=[
                    pl.BlockSpec((1, c_blk, p_tile), lambda n, c, p: (n, c, p)),
                    pl.BlockSpec((1, c_blk, 1), lambda n, c, p: (n, c, 0)),
                    pl.BlockSpec((1, c_blk, 1), lambda n, c, p: (n, c, 0)),
                ],
                scratch_shapes=[pltpu.VMEM((c_blk, 1), jnp.float32),
                                pltpu.VMEM((c_blk, 1), jnp.float32)],
            ),
            compiler_params=pltpu.CompilerParams(
                dimension_semantics=("parallel", "parallel", "arbitrary"),
                vmem_limit_bytes=vmem_limit),
            cost_estimate=cost,
        )(patches, w_t)

        inv_p = jnp.float32(1.0 / P)
        mean = s1 * inv_p
        var = jnp.maximum(s2 * inv_p - mean * mean, 0.0)
        scale = lax.rsqrt(var + EPS)
        shift = -mean * scale

        # ---- fallback phase 2: normalize + LeakyReLU -------------------
        out = pl.pallas_call(
            _norm_act_kernel,
            out_shape=jax.ShapeDtypeStruct((N, C_out, p_pad), out_dtype),
            grid_spec=pltpu.PrefetchScalarGridSpec(
                num_scalar_prefetch=0,
                grid=grid,
                in_specs=[
                    pl.BlockSpec((1, c_blk, p_tile), lambda n, c, p: (n, c, p)),
                    pl.BlockSpec((1, c_blk, 1), lambda n, c, p: (n, c, 0)),
                    pl.BlockSpec((1, c_blk, 1), lambda n, c, p: (n, c, 0)),
                ],
                out_specs=pl.BlockSpec((1, c_blk, p_tile),
                                       lambda n, c, p: (n, c, p)),
            ),
            compiler_params=pltpu.CompilerParams(
                dimension_semantics=("parallel", "parallel", "parallel"),
                vmem_limit_bytes=vmem_limit),
        )(conv_y, scale, shift)

    if p_pad != P:
        out = out[:, :, :P]
    return out.reshape(N, C_out, H_out, W_out)


def reference_forward(x_nchw, weight, bias, stride):
    """Pure-JAX f32 reference mirroring the PyTorch module (bias included)."""
    y = lax.conv_general_dilated(
        x_nchw, weight, window_strides=(stride, stride),
        padding=((1, 1), (1, 1)),
        dimension_numbers=("NCHW", "OIHW", "NCHW"))
    y = y + bias.reshape(1, -1, 1, 1)
    mean = jnp.mean(y, axis=(2, 3), keepdims=True)
    var = jnp.mean((y - mean) ** 2, axis=(2, 3), keepdims=True)
    y = (y - mean) / jnp.sqrt(var + EPS)
    return jnp.where(y >= 0, y, NEG_SLOPE * y)


if __name__ == "__main__":
    key = jax.random.PRNGKey(0)
    cases = [
        # (N, C_in, C_out, H, W, stride, extra kwargs)
        (2, 4, 16, 16, 16, 2, dict(channel_blocks=2)),          # fused, 1 P tile, 2 C blocks
        (1, 3, 8, 16, 16, 1, {}),                               # fused, stride 1
        (1, 4, 16, 32, 32, 1, dict(max_p_tile=256)),            # fused, multi P tile + pad
        (1, 4, 16, 32, 32, 1, dict(max_p_tile=256,
                                   fused_cap_bytes=0)),         # two-phase fallback
    ]
    for idx, (N, C_in, C_out, H, W, stride, kw) in enumerate(cases):
        key, kx, kwt, kb = jax.random.split(key, 4)
        x = jax.random.normal(kx, (N, C_in, H, W), dtype=jnp.float32)
        weight = 0.1 * jax.random.normal(kwt, (C_out, C_in, 4, 4), dtype=jnp.float32)
        bias = 0.1 * jax.random.normal(kb, (C_out,), dtype=jnp.float32)

        out = jax.block_until_ready(block_forward(x, weight, bias, stride, **kw))
        ref = reference_forward(x, weight, bias, stride)
        assert out.shape == ref.shape, (idx, out.shape, ref.shape)
        # bf16 MXU inputs with f32 accumulation; loose-but-safe tolerance vs
        # the pure f32 reference.
        assert jnp.allclose(out, ref, atol=3e-2, rtol=3e-2), f"case {idx} mismatch"

    print("KERNEL_OK")
</pallas_src>

<mosaic_0001>
module attributes {stable_mosaic.version = 11 : i64} {
  func.func @kernel(%arg0: i32, %arg1: i32, %arg2: i32, %arg3: memref<1x64x64xbf16, #tpu.memory_space<vmem>>, %arg4: memref<8x64xbf16, #tpu.memory_space<vmem>>, %arg5: memref<1x8x64xf32, #tpu.memory_space<vmem>>, %arg6: memref<8x1xf32, #tpu.memory_space<vmem>>, %arg7: memref<8x1xf32, #tpu.memory_space<vmem>>) attributes {dimension_semantics = [#tpu.dimension_semantics<parallel>, #tpu.dimension_semantics<parallel>, #tpu.dimension_semantics<arbitrary>], iteration_bounds = array<i64: 2, 2, 1>, scalar_prefetch = 0 : i64, scratch_operands = 2 : i64, tpu.core_type = #tpu.core_type<tc>, window_params = [{transform_indices = @transform_0, window_bounds = array<i64: 1, 64, 64>}, {transform_indices = @transform_1, window_bounds = array<i64: 8, 64>}, {transform_indices = @transform_2, window_bounds = array<i64: 1, 8, 64>}]} {
    %c0_i32 = arith.constant 0 : i32
    %0 = arith.cmpi eq, %arg2, %c0_i32 : i32
    %1 = arith.extui %0 : i1 to i32
    %c0_i32_0 = arith.constant 0 : i32
    %2 = arith.cmpi ne, %1, %c0_i32_0 : i32
    scf.if %2 {
      %cst_17 = arith.constant 0.000000e+00 : f32
      %21 = vector.broadcast %cst_17 : f32 to vector<8x1xf32>
      %c0_18 = arith.constant 0 : index
      %c0_19 = arith.constant 0 : index
      %22 = vector.load %arg6[%c0_18, %c0_19] : memref<8x1xf32, #tpu.memory_space<vmem>>, vector<8x1xf32>
      tpu.vector_store %arg6[%c0_18, %c0_19], %21 {strides = array<i32>} : memref<8x1xf32, #tpu.memory_space<vmem>>, vector<8x1xf32>,
      %cst_20 = arith.constant 0.000000e+00 : f32
      %23 = vector.broadcast %cst_20 : f32 to vector<8x1xf32>
      %c0_21 = arith.constant 0 : index
      %c0_22 = arith.constant 0 : index
      %24 = vector.load %arg7[%c0_21, %c0_22] : memref<8x1xf32, #tpu.memory_space<vmem>>, vector<8x1xf32>
      tpu.vector_store %arg7[%c0_21, %c0_22], %23 {strides = array<i32>} : memref<8x1xf32, #tpu.memory_space<vmem>>, vector<8x1xf32>,
    } else {
    }
    %c0 = arith.constant 0 : index
    %c0_1 = arith.constant 0 : index
    %3 = vector.load %arg4[%c0, %c0_1] : memref<8x64xbf16, #tpu.memory_space<vmem>>, vector<8x64xbf16>
    %c0_2 = arith.constant 0 : index
    %c0_3 = arith.constant 0 : index
    %c0_4 = arith.constant 0 : index
    %4 = vector.load %arg3[%c0_2, %c0_3, %c0_4] : memref<1x64x64xbf16, #tpu.memory_space<vmem>>, vector<1x64x64xbf16>
    %5 = vector.shape_cast %4 : vector<1x64x64xbf16> to vector<64x64xbf16>
    %cst = arith.constant dense<0.000000e+00> : vector<8x64xf32>
    %6 = tpu.matmul %3, %5, %cst {dimension_numbers = #tpu.dot_dimension_numbers<[1], [0], [0], [1], [0, 0, 1, 1], [], []>} : vector<8x64xbf16>, vector<64x64xbf16>, vector<8x64xf32> -> vector<8x64xf32>
    %c0_5 = arith.constant 0 : index
    %c0_6 = arith.constant 0 : index
    %7 = vector.load %arg6[%c0_5, %c0_6] : memref<8x1xf32, #tpu.memory_space<vmem>>, vector<8x1xf32>
    %cst_7 = arith.constant dense<0.000000e+00> : vector<8xf32>
    %8 = vector.multi_reduction <add>, %6, %cst_7 [1] : vector<8x64xf32> to vector<8xf32>
    %9 = vector.shape_cast %8 : vector<8xf32> to vector<8x1xf32>
    %10 = arith.addf %7, %9 : vector<8x1xf32>
    %c0_8 = arith.constant 0 : index
    %c0_9 = arith.constant 0 : index
    %11 = vector.load %arg6[%c0_8, %c0_9] : memref<8x1xf32, #tpu.memory_space<vmem>>, vector<8x1xf32>
    tpu.vector_store %arg6[%c0_8, %c0_9], %10 {strides = array<i32>} : memref<8x1xf32, #tpu.memory_space<vmem>>, vector<8x1xf32>,
    %c0_10 = arith.constant 0 : index
    %c0_11 = arith.constant 0 : index
    %12 = vector.load %arg7[%c0_10, %c0_11] : memref<8x1xf32, #tpu.memory_space<vmem>>, vector<8x1xf32>
    %13 = arith.mulf %6, %6 : vector<8x64xf32>
    %cst_12 = arith.constant dense<0.000000e+00> : vector<8xf32>
    %14 = vector.multi_reduction <add>, %13, %cst_12 [1] : vector<8x64xf32> to vector<8xf32>
    %15 = vector.shape_cast %14 : vector<8xf32> to vector<8x1xf32>
    %16 = arith.addf %12, %15 : vector<8x1xf32>
    %c0_13 = arith.constant 0 : index
    %c0_14 = arith.constant 0 : index
    %17 = vector.load %arg7[%c0_13, %c0_14] : memref<8x1xf32, #tpu.memory_space<vmem>>, vector<8x1xf32>
    tpu.vector_store %arg7[%c0_13, %c0_14], %16 {strides = array<i32>} : memref<8x1xf32, #tpu.memory_space<vmem>>, vector<8x1xf32>,
    %c0_i32_15 = arith.constant 0 : i32
    %18 = arith.cmpi eq, %arg2, %c0_i32_15 : i32
    %19 = arith.extui %18 : i1 to i32
    %c0_i32_16 = arith.constant 0 : i32
    %20 = arith.cmpi ne, %19, %c0_i32_16 : i32
    scf.if %20 {
      %c0_17 = arith.constant 0 : index
      %c0_18 = arith.constant 0 : index
      %21 = vector.load %arg6[%c0_17, %c0_18] : memref<8x1xf32, #tpu.memory_space<vmem>>, vector<8x1xf32>
      %cst_19 = arith.constant 1.562500e-02 : f32
      %22 = vector.broadcast %cst_19 : f32 to vector<8x1xf32>
      %23 = arith.mulf %21, %22 : vector<8x1xf32>
      %c0_20 = arith.constant 0 : index
      %c0_21 = arith.constant 0 : index
      %24 = vector.load %arg7[%c0_20, %c0_21] : memref<8x1xf32, #tpu.memory_space<vmem>>, vector<8x1xf32>
      %cst_22 = arith.constant 1.562500e-02 : f32
      %25 = vector.broadcast %cst_22 : f32 to vector<8x1xf32>
      %26 = arith.mulf %24, %25 : vector<8x1xf32>
      %27 = arith.mulf %23, %23 : vector<8x1xf32>
      %28 = arith.subf %26, %27 : vector<8x1xf32>
      %cst_23 = arith.constant 0.000000e+00 : f32
      %29 = vector.broadcast %cst_23 : f32 to vector<8x1xf32>
      %30 = arith.maximumf %28, %29 : vector<8x1xf32>
      %cst_24 = arith.constant 9.99999974E-6 : f32
      %31 = vector.broadcast %cst_24 : f32 to vector<8x1xf32>
      %32 = arith.addf %30, %31 : vector<8x1xf32>
      %33 = math.rsqrt %32 : vector<8x1xf32>
      %cst_25 = arith.constant 0.000000e+00 : f32
      %34 = vector.broadcast %cst_25 : f32 to vector<8x1xf32>
      %35 = arith.subf %34, %23 : vector<8x1xf32>
      %36 = arith.mulf %35, %33 : vector<8x1xf32>
      %37 = vector.broadcast %33 : vector<8x1xf32> to vector<8x64xf32>
      %38 = arith.mulf %6, %37 : vector<8x64xf32>
      %39 = vector.broadcast %36 : vector<8x1xf32> to vector<8x64xf32>
      %40 = arith.addf %38, %39 : vector<8x64xf32>
      %cst_26 = arith.constant 2.000000e-01 : f32
      %41 = vector.broadcast %cst_26 : f32 to vector<8x64xf32>
      %42 = arith.mulf %41, %40 : vector<8x64xf32>
      %43 = arith.maximumf %40, %42 : vector<8x64xf32>
      %c0_27 = arith.constant 0 : index
      %c0_28 = arith.constant 0 : index
      %c0_29 = arith.constant 0 : index
      %44 = vector.load %arg5[%c0_27, %c0_28, %c0_29] : memref<1x8x64xf32, #tpu.memory_space<vmem>>, vector<1x8x64xf32>
      %45 = vector.shape_cast %44 : vector<1x8x64xf32> to vector<8x64xf32>
      %46 = vector.shape_cast %43 : vector<8x64xf32> to vector<1x8x64xf32>
      tpu.vector_store %arg5[%c0_27, %c0_28, %c0_29], %46 {strides = array<i32>} : memref<1x8x64xf32, #tpu.memory_space<vmem>>, vector<1x8x64xf32>,
    } else {
    }
    return
  }
  func.func @transform_0(%arg0: i32, %arg1: i32, %arg2: i32) -> (i32, i32, i32) {
    %c0_i32 = arith.constant 0 : i32
    %c0_i32_0 = arith.constant 0 : i32
    return %arg0, %c0_i32, %arg2 : i32, i32, i32
  }
  func.func @transform_1(%arg0: i32, %arg1: i32, %arg2: i32) -> (i32, i32) {
    %c0_i32 = arith.constant 0 : i32
    %c0_i32_0 = arith.constant 0 : i32
    return %arg1, %c0_i32 : i32, i32
  }
  func.func @transform_2(%arg0: i32, %arg1: i32, %arg2: i32) -> (i32, i32, i32) {
    %c0_i32 = arith.constant 0 : i32
    %c0_i32_0 = arith.constant 0 : i32
    return %arg0, %arg1, %c0_i32 : i32, i32, i32
  }
}

</mosaic_0001>

<bundles_post_ra>
// kernel: tpu_custom_call.1
= control target key start
LH: loop header
LB: loop body
LE: loop exit
PB: predicated region body
PF: predicated region fallthrough
CT: control target
= control target key end

     0   :  { %s1126_s0 = inlined_call_operand.hbm [shape: bf16[2,64,64], index: 0, kind: input, shape index: {}]   ;;  %s1127_s1 = inlined_call_operand.hbm [shape: bf16[16,64], index: 1, kind: input, shape index: {}]   ;;  %s1128_s2 = inlined_call_operand.hbm [shape: f32[2,16,64], index: 2, kind: output, shape index: {}]  }
   0x1   :  { %1135 = sst [smem:[#allocation20_spill]] %s1126_s0 }
   0x2   :  { %7 = vsyncpa [#allocation5], 0 }
   0x3   :  { %9 = vsyncpa [#allocation5 + $0x1], 0 }
   0x4   :  { %10 = vsyncpa [#allocation8], 0 }
   0x5   :  { %12 = vsyncpa [#allocation8 + $0x1], 0 }
   0x6   :  { %13 = vsyncpa [#allocation6], 0 }
   0x7   :  { %15 = vsyncpa [#allocation6 + $0x1], 0  ;;  %s876_s9 = smov 0   ;;  %s878_s10 = smov 0  }
   0x8   :  { %s880_s11 = smov 0   ;;  %s882_s12 = smov 0  }
   0x9   :  { %s884_s13 = smov 0   ;;  %s886_s14 = smov 0  }
   0xa   :  { %s888_s15 = smov 0   ;;  %s890_s16 = smov 0  }
   0xb   :  { %s892_s17 = smov 0   ;;  %s894_s18 = smov 0  }
   0xc   :  { %s896_s19 = smov 0   ;;  %s898_s20 = smov 0  }
   0xd   :  { %s900_s21 = smov 0   ;;  %s902_s22 = smov 0  }
   0xe LB: > { %1136 = sst [smem:[#allocation13_spill]] %s835_s17  ;;  %p56_p0 = scmp.ne.s32.totalorder %s835_s17, %s831_s16  ;;  %s855_s22 = sphi %s902_s22, %s21_s22   ;;  %s851_s21 = sphi %s900_s21, %s1158_s21   ;;  %s847_s20 = sphi %s898_s20, %s1157_s20   ;;  %s843_s19 = sphi %s896_s19, %s1156_s19   ;;  %s839_s18 = sphi %s894_s18, %s1155_s18   ;;  %s835_s17 = sphi %s892_s17, %s1154_s17   ;;  %s831_s16 = sphi %s890_s16, %s1166_s16   ;;  %s827_s15 = sphi %s888_s15, %s1165_s15   ;;  %s823_s14 = sphi %s886_s14, %s1164_s14   ;;  %s819_s13 = sphi %s884_s13, %s1163_s13   ;;  %s815_s12 = sphi %s882_s12, %s1162_s12   ;;  %s811_s11 = sphi %s880_s11, %s1161_s11   ;;  %s807_s10 = sphi %s878_s10, %s1160_s10   ;;  %s803_s9 = sphi %s876_s9, %s1159_s9  }
   0xf   : > { %1137 = sst [smem:[#allocation14_spill]] %s847_s20  ;;  %s49_s23 = sadd.s32 1, %s835_s17 }
  0x10   : > { %1138 = sst [smem:[#allocation15_spill]] %s851_s21  ;;  %p57_p1 = scmp.eq.s32.totalorder %s855_s22, 0 }
  0x11   : > { %p1129_p2 = scmp.lt.s32.totalorder %s855_s22, 4  ;;  %s140_s24 = sand.u32 1, %s835_s17  }
  0x12   : > { %p58_p3 = por %p57_p1, %p56_p0  ;;  %s470_s25 = sshll.u32 %s140_s24, 5 }
  0x13   : > { %s501_s26 = sshll.u32 %s851_s21, 5  ;;  %s1139_s0 = sld [smem:[#allocation20_spill]] }
  0x14   : > { %s144_s30 = scalar_lea.vmem [#allocation4], %s470_s25  ;;  %p513_p4 = pnand %p1129_p2, %p58_p3 }
  0x15   : > { %s153_s3 = sshll.u32 %s144_s30, 4  ;;  %p475_p5 = scmp.ge.s32.totalorder %s855_s22, 1  ;;  %s154_s3 = int_to_ptr.vmem [resolvable:$true] %s153_s3 }
  0x16   : > { %s141_s5 = scalar_lea.sflag [#allocation5], %s140_s24  ;;  %s857_s6 = smov 64  }
  0x17   : > { %s858_s7 = smov 4   ;;  %p62_p6 = scmp.ne.s32.totalorder %s831_s16, %s827_s15 }
  0x18   : > { %p180_p7 = scmp.lt.s32.totalorder %s855_s22, 5  ;;  %s466_s25 = sadd.s32 4294967295, %s855_s22  }
  0x19   : > { %s150_s29 = scalar_lea.hbm %s1139_s0, %s501_s26  ;;  %s36_s26 = sadd.s32 1, %s847_s20 }
  0x1a   : > { %s151_s4 = sshll.u32 %s150_s29, 4  ;;  %p964_p8 = pnand %p475_p5, %p180_p7  ;;  %s152_s4 = int_to_ptr.hbm [resolvable:$true] %s151_s4 }
  0x1b   : > { %515 = dma.hbm_to_vmem [thread:$0]  (!%p513_p4), %s152_s4, 512, %s154_s3, %s141_s5, %s857_s6, %s857_s6, %s858_s7  }
  0x1c   : > { %s40_s27 = sadd.s32 1, %s851_s21  ;;  %p38_p9 = scmp.ge.s32.totalorder %s36_s26, 2 }
  0x1d   : > { %p971_p10 = scmp.eq.s32.totalorder %s466_s25, 0  ;;  %s467_s15 = sadd.s32 4294967294, %s855_s22  }
  0x1e   : > { %s75_s28 = sadd.s32 1, %s823_s14  ;;  %s1168_s26 = smov (%p38_p9, %s36_s26), 0 }
  0x1f   : > { %1142 = sst [smem:[#allocation16_spill]] %s1168_s26  ;;  %s1170_s27 = smov (!%p38_p9, %s40_s27), %s851_s21 }
  0x20   : > { %p982_p11 = por %p971_p10, %p62_p6  ;;  %s72_s30 = ssub.s32 %s847_s20, %s1168_s26 }
  0x21   : > { %p42_p12 = scmp.ge.s32.totalorder %s1170_s27, 2  ;;  %p73_p13 = scmp.eq.s32.totalorder %s72_s30, 0 }
  0x22   : > { %p82_p0 = scmp.ne.s32.totalorder %s823_s14, %s819_s13  ;;  %p88_p3 = scmp.ne.s32.totalorder %s819_s13, %s815_s12 }
  0x23   : > { %s1172_s27 = smov (%p42_p12, %s1170_s27), 0  ;;  %s103_s12 = sadd.s32 1, %s811_s11 }
  0x24   : > { %1144 = sst [smem:[#allocation17_spill]] %s1172_s27  ;;  %s44_s4 = ssub.s32 %s851_s21, %s1172_s27 }
  0x25   : > { %s995_s3 = scalar_select %p73_p13, %s823_s14, %s75_s28  }
  0x26   : > { %p1001_p4 = por %p88_p3, %p971_p10  ;;  %p47_p5 = scmp.eq.s32.totalorder %s44_s4, 0 }
  0x27   : > { %1145 = sst [smem:[#allocation18_spill]] %s995_s3  ;;  %s100_s6 = sor.u32 %s72_s30, %s44_s4 }
  0x28   : > { %p101_p6 = scmp.eq.s32.totalorder %s100_s6, 0  ;;  %p113_p7 = scmp.ne.s32.totalorder %s811_s11, %s807_s10 }
  0x29   : > { %s1009_s7 = scalar_select %p47_p5, %s835_s17, %s49_s23  }
  0x2a   : > { %s1012_s0 = scalar_select %p101_p6, %s811_s11, %s103_s12  }
  0x2b   : > { %1147 = sst [smem:[#allocation19_spill]] %s1009_s7  ;;  %p114_p9 = scmp.eq.s32.totalorder %s466_s25, 3 }
  0x2c   : > { %p119_p12 = scmp.ne.s32.totalorder %s807_s10, %s803_s9  ;;  %p120_p13 = scmp.eq.s32.totalorder %s467_s15, 3 }
  0x2d   : > { %p1018_p2 = por %p114_p9, %p113_p7  ;;  %s163_s28 = sand.u32 1, %s823_s14  }
  0x2e   : > { %p84_p10 = por %p82_p0, %p57_p1  ;;  %p1028_p3 = por %p120_p13, %p119_p12 }
  0x2f   : > { %s473_s23 = sshll.u32 %s163_s28, 2  ;;  %s474_s4 = sshll.u32 %s847_s20, 2 }
  0x30   : > { %s171_s25 = scalar_lea.hbm %s1127_s1, %s474_s4  ;;  %s167_s15 = scalar_lea.vmem [#allocation7], %s473_s23 }
  0x31   : > { %s173_s27 = sshll.u32 %s171_s25, 4  ;;  %s175_s26 = sshll.u32 %s167_s15, 4  ;;  %s174_s27 = int_to_ptr.hbm [resolvable:$true] %s173_s27  ;;  %s176_s26 = int_to_ptr.vmem [resolvable:$true] %s175_s26 }
  0x32   : > { %p1150_p5 = scmp.lt.s32.totalorder %s855_s22, 4  ;;  %s164_s21 = scalar_lea.sflag [#allocation8], %s163_s28 }
  0x33   : > { %184 = sbr.rel (%p964_p8) target bundleno = 496 (0x1f0), region = 28  ;;  %s186_s7 = sand.u32 (!%p964_p8), 1, %s831_s16  }
  0x34   : > { %p516_p6 = pnand %p1150_p5, %p84_p10  ;;  %s476_s20 = sshll.u32 (!%p964_p8), %s186_s7, 5 }
  0x35   : > { %s187_s17 = scalar_lea.sflag (!%p964_p8), [#allocation5], %s186_s7  ;;  %s190_s3 = scalar_lea.vmem (!%p964_p8), [#allocation4], %s476_s20 }
  0x36   : > { %518 = dma.hbm_to_vmem [thread:$0]  (!%p516_p6), %s174_s27, 64, %s176_s26, %s164_s21  }
  0x38   : > { %790 = dma.done.wait (%p982_p11), %s187_s17, 512  }
  0x39   : > { %792 = vsyncadd (%p982_p11), %s187_s17, 4294966784  ;;  %s196_s23 = sand.u32 1, %s819_s13  }
  0x3a   : > { %s477_s4 = sshll.u32 %s196_s23, 2  ;;  %s197_s28 = scalar_lea.sflag [#allocation8], %s196_s23 }
  0x3b   : > { %s200_s21 = scalar_lea.vmem [#allocation7], %s477_s4 }
  0x3c   : > { %794 = dma.done.wait (%p1001_p4), %s197_s28, 64  }
  0x3d   : > { %796 = vsyncadd (%p1001_p4), %s197_s28, 4294967232  ;;  %v505_v0 = vld [vmem:[%s190_s3 + $0x18] sm:$0xff]  ;;  %v504_v1 = vld [vmem:[%s190_s3 + $0x10] sm:$0xff]  ;;  %vm268_vm0 = vcmask 523264   ;;  %vm232_vm1 = vcmask 7168   ;;  %v859_v5 = vmov 0.0  }
  0x3e   : > { %276 = vmatpush.bf16.msra.mxu0 %v505_v0  ;;  %v503_v2 = vld [vmem:[%s190_s3 + $0x8] sm:$0xff]  ;;  %v502_v3 = vld [vmem:[%s190_s3] sm:$0xff]  ;;  %233 = vst.msk [vmem:[#allocation2] sm:$0xff] %vm232_vm1, %v859_v5  ;;  %v860_v11 = vmov 0   ;;  %s497_s17 = sshll.u32 %s843_s19, 1  ;;  %s224_s20 = sand.u32 1, %s807_s10  }
  0x3f   : > { %v235_v4 = vld [vmem:[%s200_s21] sm:$0xf]  ;;  %234 = vst.msk [vmem:[#allocation3] sm:$0xff] %vm232_vm1, %v859_v5  ;;  %641 = vset.pattern.permute.xlu1 %v860_v11  ;;  %642 = vset.pattern.permute.xlu0 %v860_v11  ;;  %s348_s8 = sadd.s32 %s839_s18, %s497_s17  ;;  %s478_s26 = sshll.u32 %s224_s20, 3 }
  0x40   : > { %s498_s27 = sshll.u32 %s348_s8, 3  ;;  %s226_s7 = scalar_lea.vmem [#allocation9], %s478_s26 }
  0x41   : > { %s350_s5 = scalar_lea.hbm %s1128_s2, %s498_s27  ;;  %s352_s6 = sshll.u32 %s226_s7, 4  ;;  %s353_s6 = int_to_ptr.vmem [resolvable:$true] %s352_s6 }
  0x42   : > { %277 = vmatpush.bf16.msra.mxu0 %v504_v1  ;;  %s354_s12 = sshll.u32 %s350_s5, 4  ;;  %s338_s18 = scalar_lea.sflag [#allocation6], %s224_s20  ;;  %s355_s12 = int_to_ptr.hbm [resolvable:$true] %s354_s12 }
  0x43   : > { %s719_s19 = sshra.s32 %s355_s12, 4  ;;  %s725_s4 = scalar_lea.hbm %s1128_s2, 32  ;;  %s720_s19 = int_to_ptr.hbm [resolvable:$true] %s719_s19 }
  0x44   : > { %s721_s25 = scalar_lea.hbm %s720_s19, 8  ;;  %p726_p0 = scmp.lt.s32.totalorder %s720_s19, %s1128_s2 }
  0x45   : > { %v285_v12 = vld [vmem:[#allocation2] sm:$0xff]  ;;  %p722_p1 = scmp.ne.s32.totalorder %s720_s19, %s721_s25  ;;  %p727_p4 = scmp.lt.s32.totalorder %s725_s4, %s721_s25 }
  0x46   : > { %278 = vmatpush.bf16.msra.mxu0 %v503_v2  ;;  %v292_v15 = vld [vmem:[#allocation3] sm:$0xff] }
  0x47   : > { %p723_p8 = pnand %p722_p1, %p1018_p2  ;;  %p728_p7 = por %p727_p4, %p726_p0 }
  0x49   : > { %p724_p11 = pneg %p723_p8 }
  0x4a   : > { %279 = vmatpush.bf16.msra.mxu0 %v502_v3 }
  0x4b   : > { %p729_p9 = pnand %p728_p7, %p724_p11 }
  0x4d   : > { %495 = vmatmul.msk.bf16.vlgmr.msra.gmra.mxu0 %vm268_vm0, %v235_v4 }
  0xca   : > { %v281_v6 = vpop.f32.mrf.mxu0 }
  0xcb   : > { %v286_v7 = vsel %vm268_vm0, %v281_v6, 0.0  ;;  %v293_v8 = vmul.f32 %v281_v6, %v281_v6 }
  0xcc   : > { %287 = vadd.xlane.f32.xlu0 %v286_v7 }
  0xcd   : > { %v294_v10 = vsel %vm268_vm0, %v293_v8, 0.0 }
  0xd2   : > { %v283_v9 = vpop.f32.mrf.mxu0 }
  0xd4   : > { %295 = vadd.xlane.f32.xlu0 %v294_v10 }
 0x13f   : > { %v288_v13 = vpop.xlane.xlu0 %287 }
 0x140   : > { %v289_v14 = vadd.f32 %v288_v13, %v285_v12 }
 0x142   : > { %291 = vst.msk [vmem:[#allocation2] sm:$0xff] %vm232_vm1, %v289_v14 }
 0x147   : > { %v296_v16 = vpop.xlane.xlu0 %295 }
 0x148   : > { %v297_v17 = vadd.f32 %v296_v16, %v292_v15 }
 0x149   : > { %v302_v18 = vld [vmem:[#allocation2] sm:$0xff] }
 0x14a   : > { %298 = vst.msk [vmem:[#allocation3] sm:$0xff] %vm232_vm1, %v297_v17  ;;  %v303_v19 = vmul.f32 0.015625, %v302_v18 }
 0x14c   : > { %v306_v22 = vmul.f32 %v303_v19, %v303_v19  ;;  %v320_v33 = vsub.f32 0.0, %v303_v19 }
 0x151   : > { %v304_v20 = vld [vmem:[#allocation3] sm:$0xff] }
 0x152   : > { %v305_v21 = vmul.f32 0.015625, %v304_v20 }
 0x154   : > { %v307_v23 = vsub.f32 %v305_v21, %v306_v22 }
 0x156   : > { %v308_v24 = vmax.f32 %v307_v23, 0.0 }
 0x158   : > { %v309_v25 = vadd.f32 1e-05, %v308_v24 }
 0x15a   : > { %643 = vrsqrt.f32 %v309_v25  ;;  %vm316_vm3 = vweird.f32 %v309_v25 }
 0x160   : > { %v644_v26 = vpop.eup %643 }
 0x161   : > { %v311_v27 = vmul.f32 %v644_v26, %v309_v25  ;;  %vm317_vm2 = vweird.f32 %v644_v26 }
 0x162   : > { %vm318_vm4 = vmor %vm316_vm3, %vm317_vm2 }
 0x163   : > { %v312_v28 = vmul.f32 %v644_v26, %v311_v27 }
 0x165   : > { %v313_v29 = vmul.f32 0.5, %v312_v28 }
 0x167   : > { %v314_v30 = vsub.f32 1.5, %v313_v29 }
 0x169   : > { %v315_v31 = vmul.f32 %v644_v26, %v314_v30 }
 0x16b   : > { %v319_v32 = vsel %vm318_vm4, %v644_v26, %v315_v31 }
 0x16c   : > { %324 = vperm.xlu1 %641, %v319_v32   ;;  %v321_v34 = vmul.f32 %v320_v33, %v319_v32 }
 0x174   : > { %330 = vperm.xlu1 %641, %v321_v34  }
 0x1de   : > { %v325_v35 = vpop.permute.xlu1 %324 }
 0x1df   : > { %v327_v36 = vmul.f32 %v325_v35, %v281_v6 }
 0x1e6   : > { %v331_v37 = vpop.permute.xlu1 %330 }
 0x1e7   : > { %v333_v38 = vadd.f32 %v331_v37, %v327_v36 }
 0x1e9   : > { %v334_v39 = vmul.f32 0.2, %v333_v38 }
 0x1eb   : > { %v335_v40 = vmax.f32 %v333_v38, %v334_v39 }
 0x1ed   : > { %336 = vst.msk [vmem:[%s226_s7] sm:$0xff] %vm268_vm0, %v335_v40 }
 0x1ee   : > { %732 = shalt.err (!%p729_p9)
}
 0x1ef   : > { %510 = dma.vmem_to_hbm [thread:$0]  (%p1018_p2), %s353_s6, 128, %s355_s12, %s338_s18  }
 0x1f0 PF: > { %p524_p12 = scmp.ge.s32.totalorder %s855_s22, 2  ;;  %s366_s17 = sand.u32 1, %s803_s9  }
 0x1f1   : > { %s367_s20 = scalar_lea.sflag [#allocation6], %s366_s17 }
 0x1f2   : > { %p520_p13 = pnand %p524_p12, %p1028_p3 }
 0x1f4   : > { %p521_p10 = pneg %p520_p13 }
 0x1f6   : > { %798 = dma.done.wait (%p521_p10), %s367_s20, 128  }
 0x1f7   : > { %800 = vsyncadd (%p521_p10), %s367_s20, 4294967168  ;;  %s21_s22 = sadd.s32 1, %s855_s22   ;;  %s1152_s24 = sld [smem:[#allocation18_spill]] }
 0x1f8   : > { %p1079_p5 = scmp.ge.s32.totalorder %s21_s22, 6   ;;  %s1153_s26 = sld [smem:[#allocation13_spill]] }
 0x1f9   : > { %s1154_s17 = sld [smem:[#allocation19_spill]]  ;;  %s1159_s9 = smov %s807_s10 }
 0x1fa   : > { %s1155_s18 = sld [smem:[#allocation14_spill]]  ;;  %s1160_s10 = smov %s811_s11 }
 0x1fb   : > { %s1156_s19 = sld [smem:[#allocation15_spill]]  ;;  %s1161_s11 = smov %s1012_s0 }
 0x1fc   : > { %s1157_s20 = sld [smem:[#allocation16_spill]]  ;;  %s1162_s12 = smov %s819_s13 }
 0x1fd   : > { %s1158_s21 = sld [smem:[#allocation17_spill]]  ;;  %s1163_s13 = smov %s823_s14 }
 0x1fe   : > { %s1164_s14 = smov %s1152_s24  ;;  %s1165_s15 = smov %s831_s16 }
 0x1ff   : > { %s1166_s16 = smov %s1153_s26  ;;  %20 = sbr.rel (!%p1079_p5) target bundleno = 14 (0xe), region = 94 }
 0x204   :  { %373 = vsyncpa [#allocation5], 1 }
 0x205   :  { %375 = vsyncpa [#allocation5 + $0x1], 1 }
 0x206   :  { %376 = vsyncpa [#allocation8], 1 }
 0x207   :  { %378 = vsyncpa [#allocation8 + $0x1], 1 }
 0x208   :  { %379 = vsyncpa [#allocation6], 1 }
 0x209   :  { %381 = vsyncpa [#allocation6 + $0x1], 1 }

</bundles_post_ra>
